<compile_context>
chip_gen: v6e
topology: v6e:2x2x1
jax: 0.10.0
libtpu: 0.0.40
codegen_flags: <defaults>
</compile_context>

<pallas_src>
import jax
import jax.numpy as jnp
from jax.experimental import pallas as pl
from jax.experimental.pallas import tpu as pltpu


def _se_kernel(x_ref, w1_ref, w2_ref, o_ref):
    # x_ref : (1, C, HW) in the caller's dtype (f32 or bf16)
    # w1_ref: (Cr, C) f32   (PyTorch nn.Linear layout, first FC)
    # w2_ref: (C, Cr) f32   (PyTorch nn.Linear layout, second FC)
    # o_ref : (1, C, HW) same dtype as x_ref
    x = x_ref[0]                                   # (C, HW)
    hw = x.shape[-1]

    # Squeeze: spatial sum as a matmul with a ones vector -> f32 accumulation on
    # the MXU even when x is bf16; fold 1/HW into the tiny pooled column.
    ones = jnp.ones((hw, 1), dtype=x.dtype)
    pooled = jnp.dot(x, ones, preferred_element_type=jnp.float32) * (1.0 / hw)  # (C, 1) f32

    # Excitation: tiny FC -> ReLU -> FC -> sigmoid, all in f32 on the pooled column.
    h = jnp.dot(w1_ref[...], pooled, preferred_element_type=jnp.float32)        # (Cr, 1)
    h = jnp.maximum(h, 0.0)
    g = jnp.dot(w2_ref[...], h, preferred_element_type=jnp.float32)             # (C, 1)
    gate = jax.nn.sigmoid(g)                                                     # (C, 1) f32

    # Rescale: (C, 1) gate broadcasts along the lane (HW) axis; multiply stays in
    # x's dtype (bf16 VPU on v6e/v7x; Mosaic widens automatically on v5e).
    o_ref[0] = x * gate.astype(x.dtype)


def se_layer(x_nchw, w1, w2, *, vmem_limit_bytes=None):
    """SE layer forward.

    x_nchw: (B, C, H, W), any float dtype (dtype is preserved end-to-end).
    w1:     (C//r, C)  -- first Linear weight, PyTorch layout, no bias.
    w2:     (C, C//r)  -- second Linear weight, PyTorch layout, no bias.
    """
    B, C, H, W = x_nchw.shape
    HW = H * W
    x = x_nchw.reshape(B, C, HW)                   # keep caller dtype (bf16 => half the HBM traffic)
    w1 = w1.astype(jnp.float32)                    # tiny, keep excitation math in f32
    w2 = w2.astype(jnp.float32)

    if vmem_limit_bytes is None:
        # Double-buffered (1, C, HW) input + output blocks, plus weights + slack.
        block_bytes = C * HW * x.dtype.itemsize
        vmem_limit_bytes = int(min(max(4 * block_bytes + (4 << 20), 32 << 20), 96 << 20))

    out = pl.pallas_call(
        _se_kernel,
        out_shape=jax.ShapeDtypeStruct((B, C, HW), x.dtype),
        grid=(B,),
        in_specs=[
            pl.BlockSpec((1, C, HW), lambda b: (b, 0, 0)),   # per-batch slab of x
            pl.BlockSpec(w1.shape, lambda b: (0, 0)),        # weights resident across grid
            pl.BlockSpec(w2.shape, lambda b: (0, 0)),
        ],
        out_specs=pl.BlockSpec((1, C, HW), lambda b: (b, 0, 0)),
        compiler_params=pltpu.CompilerParams(
            dimension_semantics=("parallel",),               # batch steps independent -> megacore/pipelined
            vmem_limit_bytes=vmem_limit_bytes,
        ),
    )(x, w1, w2)

    return out.reshape(B, C, H, W)


def se_layer_ref(x_nchw, w1, w2):
    """Pure-JAX reference matching the PyTorch module (f32 math)."""
    B, C, H, W = x_nchw.shape
    xf = x_nchw.astype(jnp.float32)
    y = jnp.mean(xf, axis=(2, 3))                            # (B, C)
    y = jnp.maximum(y @ w1.astype(jnp.float32).T, 0.0)       # Linear + ReLU
    y = jax.nn.sigmoid(y @ w2.astype(jnp.float32).T)         # Linear + Sigmoid
    return xf * y[:, :, None, None]


if __name__ == "__main__":
    # Module hyperparameters: channel=32, reduction=16 -> hidden = 2.
    B, C, H, W = 2, 32, 16, 16
    reduction = 16
    Cr = C // reduction

    key = jax.random.PRNGKey(0)
    kx, k1, k2 = jax.random.split(key, 3)

    x = jax.random.normal(kx, (B, C, H, W), dtype=jnp.float32)
    # PyTorch nn.Linear stores weights as (out_features, in_features).
    w1 = jax.random.normal(k1, (Cr, C), dtype=jnp.float32) * (1.0 / jnp.sqrt(C))
    w2 = jax.random.normal(k2, (C, Cr), dtype=jnp.float32) * (1.0 / jnp.sqrt(Cr))

    # f32 path: tight tolerance vs reference.
    out = jax.block_until_ready(se_layer(x, w1, w2))
    ref = se_layer_ref(x, w1, w2)
    assert out.shape == (B, C, H, W)
    assert out.dtype == x.dtype
    assert jnp.allclose(out, ref, atol=1e-5, rtol=1e-5), "f32 mismatch vs reference"

    # bf16 path: half the HBM traffic; pooled/FC/sigmoid math stays f32 inside the
    # kernel, so only the x quantization and the final bf16 rescale differ.
    x_bf16 = x.astype(jnp.bfloat16)
    out_bf16 = jax.block_until_ready(se_layer(x_bf16, w1, w2))
    ref_bf16 = se_layer_ref(x_bf16, w1, w2)   # reference on the same quantized x, f32 math
    assert out_bf16.dtype == jnp.bfloat16
    assert jnp.allclose(out_bf16.astype(jnp.float32), ref_bf16, atol=5e-2, rtol=5e-2), \
        "bf16 mismatch vs reference"

    print("KERNEL_OK")
</pallas_src>

<mosaic_0001>
module attributes {stable_mosaic.version = 11 : i64} {
  func.func @_se_kernel(%arg0: i32, %arg1: memref<1x32x256xf32, #tpu.memory_space<vmem>>, %arg2: memref<2x32xf32, #tpu.memory_space<vmem>>, %arg3: memref<32x2xf32, #tpu.memory_space<vmem>>, %arg4: memref<1x32x256xf32, #tpu.memory_space<vmem>>) attributes {dimension_semantics = [#tpu.dimension_semantics<parallel>], iteration_bounds = array<i64: 2>, scalar_prefetch = 0 : i64, scratch_operands = 0 : i64, tpu.core_type = #tpu.core_type<tc>, window_params = [{transform_indices = @transform_0, window_bounds = array<i64: 1, 32, 256>}, {pipeline_mode = #tpu.pipeline_mode<synchronous>, transform_indices = @transform_1, window_bounds = array<i64: 2, 32>}, {pipeline_mode = #tpu.pipeline_mode<synchronous>, transform_indices = @transform_2, window_bounds = array<i64: 32, 2>}, {transform_indices = @transform_3, window_bounds = array<i64: 1, 32, 256>}]} {
    %c0 = arith.constant 0 : index
    %c0_0 = arith.constant 0 : index
    %c0_1 = arith.constant 0 : index
    %0 = vector.load %arg1[%c0, %c0_0, %c0_1] : memref<1x32x256xf32, #tpu.memory_space<vmem>>, vector<1x32x256xf32>
    %1 = vector.shape_cast %0 : vector<1x32x256xf32> to vector<32x256xf32>
    %cst = arith.constant 1.000000e+00 : f32
    %2 = vector.broadcast %cst : f32 to vector<256x1xf32>
    %cst_2 = arith.constant dense<0.000000e+00> : vector<32x1xf32>
    %3 = tpu.matmul %1, %2, %cst_2 {dimension_numbers = #tpu.dot_dimension_numbers<[1], [0], [0], [1], [0, 0, 1, 1], [], []>} : vector<32x256xf32>, vector<256x1xf32>, vector<32x1xf32> -> vector<32x1xf32>
    %cst_3 = arith.constant 3.906250e-03 : f32
    %4 = vector.broadcast %cst_3 : f32 to vector<32x1xf32>
    %5 = arith.mulf %3, %4 : vector<32x1xf32>
    %c0_4 = arith.constant 0 : index
    %c0_5 = arith.constant 0 : index
    %6 = vector.load %arg2[%c0_4, %c0_5] : memref<2x32xf32, #tpu.memory_space<vmem>>, vector<2x32xf32>
    %cst_6 = arith.constant dense<0.000000e+00> : vector<2x1xf32>
    %7 = tpu.matmul %6, %5, %cst_6 {dimension_numbers = #tpu.dot_dimension_numbers<[1], [0], [0], [1], [0, 0, 1, 1], [], []>} : vector<2x32xf32>, vector<32x1xf32>, vector<2x1xf32> -> vector<2x1xf32>
    %cst_7 = arith.constant 0.000000e+00 : f32
    %8 = vector.broadcast %cst_7 : f32 to vector<2x1xf32>
    %9 = arith.maximumf %7, %8 : vector<2x1xf32>
    %c0_8 = arith.constant 0 : index
    %c0_9 = arith.constant 0 : index
    %10 = vector.load %arg3[%c0_8, %c0_9] : memref<32x2xf32, #tpu.memory_space<vmem>>, vector<32x2xf32>
    %cst_10 = arith.constant dense<0.000000e+00> : vector<32x1xf32>
    %11 = tpu.matmul %10, %9, %cst_10 {dimension_numbers = #tpu.dot_dimension_numbers<[1], [0], [0], [1], [0, 0, 1, 1], [], []>} : vector<32x2xf32>, vector<2x1xf32>, vector<32x1xf32> -> vector<32x1xf32>
    %12 = arith.negf %11 : vector<32x1xf32>
    %13 = math.exp %12 : vector<32x1xf32>
    %cst_11 = arith.constant 1.000000e+00 : f32
    %14 = vector.broadcast %cst_11 : f32 to vector<32x1xf32>
    %15 = arith.addf %14, %13 : vector<32x1xf32>
    %16 = arith.divf %14, %15 : vector<32x1xf32>
    %17 = vector.broadcast %16 : vector<32x1xf32> to vector<32x256xf32>
    %18 = arith.mulf %1, %17 : vector<32x256xf32>
    %c0_12 = arith.constant 0 : index
    %c0_13 = arith.constant 0 : index
    %c0_14 = arith.constant 0 : index
    %19 = vector.load %arg4[%c0_12, %c0_13, %c0_14] : memref<1x32x256xf32, #tpu.memory_space<vmem>>, vector<1x32x256xf32>
    %20 = vector.shape_cast %19 : vector<1x32x256xf32> to vector<32x256xf32>
    %21 = vector.shape_cast %18 : vector<32x256xf32> to vector<1x32x256xf32>
    tpu.vector_store %arg4[%c0_12, %c0_13, %c0_14], %21 {strides = array<i32>} : memref<1x32x256xf32, #tpu.memory_space<vmem>>, vector<1x32x256xf32>,
    return
  }
  func.func @transform_0(%arg0: i32) -> (i32, i32, i32) {
    %c0_i32 = arith.constant 0 : i32
    %c0_i32_0 = arith.constant 0 : i32
    %c0_i32_1 = arith.constant 0 : i32
    return %arg0, %c0_i32, %c0_i32_0 : i32, i32, i32
  }
  func.func @transform_1(%arg0: i32) -> (i32, i32) {
    %c0_i32 = arith.constant 0 : i32
    %c0_i32_0 = arith.constant 0 : i32
    %c0_i32_1 = arith.constant 0 : i32
    return %c0_i32, %c0_i32_0 : i32, i32
  }
  func.func @transform_2(%arg0: i32) -> (i32, i32) {
    %c0_i32 = arith.constant 0 : i32
    %c0_i32_0 = arith.constant 0 : i32
    %c0_i32_1 = arith.constant 0 : i32
    return %c0_i32, %c0_i32_0 : i32, i32
  }
  func.func @transform_3(%arg0: i32) -> (i32, i32, i32) {
    %c0_i32 = arith.constant 0 : i32
    %c0_i32_0 = arith.constant 0 : i32
    %c0_i32_1 = arith.constant 0 : i32
    return %arg0, %c0_i32, %c0_i32_0 : i32, i32, i32
  }
}

</mosaic_0001>

<bundles_post_ra>
// kernel: tpu_custom_call.1
= control target key start
LH: loop header
LB: loop body
LE: loop exit
PB: predicated region body
PF: predicated region fallthrough
CT: control target
= control target key end

     0   :  { %8 = vsyncpa [#allocation3], 0  ;;  %s1125_s0 = inlined_call_operand.hbm [shape: f32[2,32,256], index: 0, kind: input, shape index: {}]   ;;  %s1126_s1 = inlined_call_operand.vmem [shape: f32[2,32], index: 1, kind: input, shape index: {}]   ;;  %s1127_s2 = inlined_call_operand.vmem [shape: f32[32,2], index: 2, kind: input, shape index: {}]   ;;  %s1128_s3 = inlined_call_operand.hbm [shape: f32[2,32,256], index: 3, kind: output, shape index: {}]  }
   0x1   :  { %10 = vsyncpa [#allocation3 + $0x1], 0 }
   0x2   :  { %11 = vsyncpa [#allocation4], 0 }
   0x3   :  { %13 = vsyncpa [#allocation4 + $0x1], 0  ;;  %s910_s12 = smov 0   ;;  %s912_s13 = smov 0  }
   0x4   :  { %s914_s14 = smov 0   ;;  %s916_s15 = smov 0  }
   0x5 LB: > { %s931_s16 = sadd.s32 4294967295, %s878_s15   ;;  %s615_s17 = sadd.s32 4294967294, %s878_s15   ;;  %s878_s15 = sphi %s916_s15, %s1143_s15   ;;  %s874_s14 = sphi %s914_s14, %s1142_s14   ;;  %s870_s13 = sphi %s912_s13, %s1141_s13   ;;  %s866_s12 = sphi %s910_s12, %s1140_s12  }
   0x6   : > { %s935_s18 = sadd.s32 1, %s878_s15   ;;  %s26_s19 = sadd.s32 1, %s874_s14 }
   0x7   : > { %s23_s20 = ssub.s32 %s878_s15, %s935_s18  ;;  %p33_p0 = scmp.ne.s32.totalorder %s874_s14, %s870_s13 }
   0x8   : > { %p24_p1 = scmp.eq.s32.totalorder %s23_s20, 0  ;;  %p34_p2 = scmp.eq.s32.totalorder %s878_s15, 0 }
   0x9   : > { %p39_p3 = scmp.ne.s32.totalorder %s870_s13, %s866_s12  ;;  %p40_p4 = scmp.eq.s32.totalorder %s931_s16, 0 }
   0xa   : > { %s947_s21 = scalar_select %p24_p1, %s874_s14, %s26_s19  }
   0xb   : > { %p949_p5 = por %p34_p2, %p33_p0  ;;  %p953_p6 = por %p40_p4, %p39_p3 }
   0xc   : > { %p105_p7 = scmp.eq.s32.totalorder %s931_s16, 1  ;;  %p111_p8 = scmp.eq.s32.totalorder %s615_s17, 1 }
   0xd   : > { %s1132_s23 = scalar_select %p953_p6, 1, 0 }
   0xe   : > { %p726_p10 = scmp.lt.s32.totalorder %s878_s15, 2  ;;  %p960_p11 = por %p105_p7, %p33_p0 }
   0xf   : > { %p964_p12 = por %p111_p8, %p39_p3  ;;  %s137_s26 = sand.u32 1, %s874_s14  }
  0x10   : > { %s1133_s24 = scalar_select %p960_p11, 1, 0 }
  0x11   : > { %s1134_s25 = scalar_select %p964_p12, 1, 0 }
  0x12   : > { %s639_s27 = sshll.u32 %s878_s15, 10  ;;  %s618_s28 = sshll.u32 %s137_s26, 6 }
  0x13   : > { %s973_s4 = scalar_lea.hbm %s1125_s0, %s639_s27  ;;  %s141_s5 = scalar_lea.vmem [#allocation2], %s618_s28 }
  0x14   : > { %s148_s6 = sshll.u32 %s141_s5, 4  ;;  %p977_p13 = pnand %p726_p10, %p949_p5  ;;  %s981_s6 = int_to_ptr.vmem [resolvable:$true] %s148_s6 }
  0x15   : > { %s983_s8 = scalar_lea.sflag [#allocation3], %s137_s26  ;;  %s786_s9 = scalar_lea.hbm %s973_s4, 1024 }
  0x16   : > { %p787_p0 = scmp.ne.s32.totalorder %s973_s4, %s786_s9  ;;  %p788_p1 = pneg %p977_p13 }
  0x17   : > { %s791_s17 = scalar_lea.hbm %s1125_s0, 2048  ;;  %p792_p4 = scmp.lt.s32.totalorder %s973_s4, %s1125_s0 }
  0x18   : > { %p789_p2 = pnand %p788_p1, %p787_p0  ;;  %p793_p5 = scmp.lt.s32.totalorder %s791_s17, %s786_s9 }
  0x1a   : > { %p790_p3 = pneg %p789_p2  ;;  %p794_p7 = por %p793_p5, %p792_p4 }
  0x1c   : > { %p795_p8 = pnand %p794_p7, %p790_p3 }
  0x1e   : > { %798 = shalt.err (!%p795_p8)
}
  0x1f   : > { %s799_s22 = scalar_lea.vmem %s981_s6, 1024  ;;  %s880_s26 = smov [#allocation2]  }
  0x20   : > { %p800_p10 = scmp.ne.s32.totalorder %s981_s6, %s799_s22  ;;  %s804_s27 = sshll.u32 %s880_s26, 4  ;;  %s805_s27 = int_to_ptr.vmem [resolvable:$false] %s804_s27 }
  0x21   : > { %s806_s28 = scalar_lea.vmem %s805_s27, 2048  ;;  %p807_p2 = scmp.lt.s32.totalorder %s981_s6, %s805_s27 }
  0x22   : > { %p802_p9 = pnand %p800_p10, %p788_p1  ;;  %p808_p12 = scmp.lt.s32.totalorder %s806_s28, %s799_s22 }
  0x24   : > { %p803_p0 = pneg %p802_p9  ;;  %p809_p11 = por %p808_p12, %p807_p2 }
  0x26   : > { %p810_p6 = pnand %p809_p11, %p803_p0 }
  0x28   : > { %813 = shalt.err (!%p810_p6)
}
  0x29   : > { %s881_s29 = smov 256   ;;  %s882_s30 = smov 16  }
  0x2a   : > { %721 = dma.hbm_to_vmem [thread:$0]  (!%p977_p13), %s973_s4, 1024, %s981_s6, %s983_s8, %s881_s29, %s881_s29, %s882_s30  }
  0x2b   : > { %p621_p9 = scmp.ge.s32.totalorder %s878_s15, 1  ;;  %p156_p1 = scmp.lt.s32.totalorder %s878_s15, 3 }
  0x2d   : > { %p157_p3 = pnand %p621_p9, %p156_p1 }
  0x2e   : > { %s1007_s5 = sand.u32 (!%p157_p3), 1, %s870_s13   ;;  %p1136_p6 = scmp.ne.s32.totalorder (!%p157_p3), %s1132_s23, 0 }
  0x2f   : > { %160 = sbr.rel (%p157_p3) target bundleno = 876 (0x36c), region = 32  ;;  %s622_s9 = sshll.u32 (!%p157_p3), %s1007_s5, 6 }
  0x30   : > { %s163_s10 = scalar_lea.sflag (!%p157_p3), [#allocation3], %s1007_s5  ;;  %s1013_s11 = scalar_lea.vmem (!%p157_p3), [#allocation2], %s622_s9 }
  0x34   : > { %857 = dma.done.wait (%p1136_p6), %s163_s10, 1024  }
  0x35   : > { %859 = vsyncadd (%p1136_p6), %s163_s10, 4294966272  ;;  %v883_v0 = vmov 1.0   ;;  %v1020_v1 = vld [vmem:[%s1013_s11 + $0x8] sm:$0xff]  ;;  %v1024_v2 = vld [vmem:[%s1013_s11] sm:$0xff]  ;;  %v884_v9 = vmov 0.0   ;;  %vm885_vm0 = vmmov 0  }
  0x36   : > { %641 = vmatprep.subr.mxu0 %v883_v0  ;;  %261 = vmatprep.mubr.f32.mxu0 %v1020_v1  ;;  %v1027_v3 = vld [vmem:[%s1013_s11 + $0x18] sm:$0xff]  ;;  %v1032_v4 = vld [vmem:[%s1013_s11 + $0x10] sm:$0xff]  ;;  %v1035_v5 = vld [vmem:[%s1013_s11 + $0x28] sm:$0xff]  ;;  %vm287_vm1 = vcmask 261120   ;;  %vm366_vm2 = vcmask 15360   ;;  %vm379_vm3 = vcmask 1041408  }
  0x37   : > { %642 = vmatpush3.msra.mxu0 %v883_v0  ;;  %v1040_v6 = vld [vmem:[%s1013_s11 + $0x20] sm:$0xff]  ;;  %v1043_v7 = vld [vmem:[%s1013_s11 + $0x38] sm:$0xff]  ;;  %v1048_v8 = vld [vmem:[%s1013_s11 + $0x30] sm:$0xff]  ;;  %695 = vmatprep.subr.mxu1 %v884_v9  ;;  %v886_v34 = vmov 0   ;;  %s188_s27 = scalar_lea.vmem [#allocation5], %s622_s9  ;;  %s640_s29 = sshll.u32 %s931_s16, 10 }
  0x38   : > { %643 = vmatprep.subr.mxu0 %v883_v0  ;;  %703 = vmatprep.mubr.msk.f32.mxu1 %vm885_vm0, %v884_v9  ;;  %v286_v26 = vld [vmem:[%s1126_s1] sm:$0x3]  ;;  %v363_v31 = vld [vmem:[%s1127_s2 + $0x8] sm:$0xff]  ;;  %v364_v32 = vld [vmem:[%s1127_s2 + $0x10] sm:$0xff]  ;;  %s542_s28 = sshll.u32 %s188_s27, 4  ;;  %s1080_s10 = scalar_lea.hbm %s1128_s3, %s640_s29  ;;  %s1075_s28 = int_to_ptr.vmem [resolvable:$true] %s542_s28 }
  0x39   : > { %644 = vmatpush3.msra.mxu0 %v883_v0  ;;  %v362_v27 = vld [vmem:[%s1127_s2] sm:$0xff]  ;;  %v365_v33 = vld [vmem:[%s1127_s2 + $0x18] sm:$0xff]  ;;  %768 = vset.pattern.permute.xlu0 %v886_v34  ;;  %s529_s16 = scalar_lea.sflag [#allocation4], %s1007_s5  ;;  %s814_s11 = scalar_lea.vmem %s1075_s28, 1024 }
  0x3a   : > { %645 = vmatprep.subr.mxu0 %v883_v0  ;;  %769 = vset.pattern.permute.xlu1 %v886_v34  ;;  %p815_p11 = scmp.ne.s32.totalorder %s1075_s28, %s814_s11  ;;  %p1137_p12 = scmp.ne.s32.totalorder %s1133_s24, 0 }
  0x3b   : > { %646 = vmatpush3.msra.mxu0 %v883_v0  ;;  %s887_s23 = smov [#allocation5]  }
  0x3c   : > { %647 = vmatprep.subr.mxu0 %v883_v0  ;;  %p816_p13 = pnand %p815_p11, %p1137_p12  ;;  %s818_s4 = sshll.u32 %s887_s23, 4  ;;  %s819_s4 = int_to_ptr.vmem [resolvable:$false] %s818_s4 }
  0x3d   : > { %648 = vmatpush3.msra.mxu0 %v883_v0  ;;  %s820_s6 = scalar_lea.vmem %s819_s4, 2048  ;;  %p821_p5 = scmp.lt.s32.totalorder %s1075_s28, %s819_s4 }
  0x3e   : > { %649 = vmatprep.subr.mxu0 %v883_v0  ;;  %p817_p4 = pneg %p816_p13  ;;  %p822_p7 = scmp.lt.s32.totalorder %s820_s6, %s814_s11 }
  0x3f   : > { %650 = vmatpush3.msra.mxu0 %v883_v0 }
  0x40   : > { %651 = vmatprep.subr.mxu0 %v883_v0  ;;  %p823_p8 = por %p822_p7, %p821_p5 }
  0x41   : > { %652 = vmatpush3.msra.mxu0 %v883_v0 }
  0x42   : > { %653 = vmatprep.subr.mxu0 %v883_v0  ;;  %p824_p10 = pnand %p823_p8, %p817_p4 }
  0x43   : > { %654 = vmatpush3.msra.mxu0 %v883_v0 }
  0x44   : > { %655 = vmatprep.subr.mxu0 %v883_v0 }
  0x45   : > { %656 = vmatpush3.msra.mxu0 %v883_v0 }
  0x46   : > { %657 = vmatprep.subr.mxu0 %v883_v0 }
  0x47   : > { %658 = vmatpush3.msra.mxu0 %v883_v0 }
  0x48   : > { %659 = vmatprep.subr.mxu0 %v883_v0 }
  0x49   : > { %660 = vmatpush3.msra.mxu0 %v883_v0 }
  0x4a   : > { %661 = vmatprep.subr.mxu0 %v883_v0 }
  0x4b   : > { %662 = vmatpush3.msra.mxu0 %v883_v0 }
  0x4c   : > { %663 = vmatprep.subr.mxu0 %v883_v0 }
  0x4d   : > { %664 = vmatpush3.msra.mxu0 %v883_v0 }
  0x4e   : > { %665 = vmatprep.subr.mxu0 %v883_v0 }
  0x4f   : > { %666 = vmatpush3.msra.mxu0 %v883_v0 }
  0x50   : > { %667 = vmatprep.subr.mxu0 %v883_v0 }
  0x51   : > { %668 = vmatpush3.msra.mxu0 %v883_v0 }
  0x52   : > { %669 = vmatprep.subr.mxu0 %v883_v0 }
  0x53   : > { %670 = vmatpush3.msra.mxu0 %v883_v0 }
  0x54   : > { %671 = vmatprep.subr.mxu0 %v883_v0 }
  0x55   : > { %672 = vmatpush3.msra.mxu0 %v883_v0 }
  0x56   : > { %262 = vmatmul.mubr.f32.vlgmr.msra.gmra.mxu0 %v1024_v2 }
  0x57   : > { %266 = vmatprep.mubr.f32.mxu0 %v1027_v3 }
  0x5a   : > { %267 = vmatmul.mubr.f32.gmra.mxu0 %v1032_v4 }
  0x5b   : > { %271 = vmatprep.mubr.f32.mxu0 %v1035_v5 }
  0x5e   : > { %272 = vmatmul.mubr.f32.gmra.mxu0 %v1040_v6 }
  0x5f   : > { %276 = vmatprep.mubr.f32.mxu0 %v1043_v7 }
  0x62   : > { %277 = vmatmul.mubr.f32.gmra.mxu0 %v1048_v8 }
 0x116   : > { %v673_v10 = vpop.f32.mrf.mxu0 }
 0x118   : > { %v674_v11 = vpop.f32.mrf.mxu0 }
 0x119   : > { %v675_v22 = vadd.f32 %v674_v11, %v673_v10 }
 0x11a   : > { %v676_v12 = vpop.f32.mrf.mxu0 }
 0x11b   : > { %v282_v25 = vmul.f32 0.00390625, %v675_v22 }
 0x11c   : > { %v677_v13 = vpop.f32.mrf.mxu0 }
 0x11d   : > { %v678_v20 = vadd.f32 %v677_v13, %v676_v12 }
 0x11e   : > { %v679_v14 = vpop.f32.mrf.mxu0 }
 0x11f   : > { %v283_v24 = vmul.f32 0.00390625, %v678_v20 }
 0x120   : > { %v680_v15 = vpop.f32.mrf.mxu0 }
 0x121   : > { %v681_v18 = vadd.f32 %v680_v15, %v679_v14 }
 0x122   : > { %v682_v16 = vpop.f32.mrf.mxu0 }
 0x123   : > { %v284_v23 = vmul.f32 0.00390625, %v681_v18 }
 0x124   : > { %v683_v17 = vpop.f32.mrf.mxu0 }
 0x125   : > { %v684_v19 = vadd.f32 %v683_v17, %v682_v16 }
 0x127   : > { %v285_v21 = vmul.f32 0.00390625, %v684_v19 }
 0x129   : > { %696 = vmatpush3.msra.mxu1 %v285_v21 }
 0x12a   : > { %697 = vmatprep.subr.mxu1 %v884_v9 }
 0x12b   : > { %698 = vmatpush3.msra.mxu1 %v284_v23 }
 0x12c   : > { %699 = vmatprep.subr.mxu1 %v884_v9 }
 0x12d   : > { %700 = vmatpush3.msra.mxu1 %v283_v24 }
 0x12e   : > { %701 = vmatprep.subr.mxu1 %v884_v9 }
 0x12f   : > { %702 = vmatpush3.msra.mxu1 %v282_v25 }
 0x130   : > { %704 = vmatmul.mubr.msk.f32.vlgmr.msra.gmra.mxu1 %vm287_vm1, %v286_v26 }
 0x131   : > { %708 = vmatprep.mubr.msk.f32.mxu1 %vm366_vm2, %v362_v27 }
 0x1f0   : > { %v357_v28 = vpop.f32.mrf.mxu1 }
 0x1f1   : > { %v361_v29 = vmax.f32 %v357_v28, 0.0 }
 0x1f2   : > { %v705_v30 = vpop.f32.mrf.mxu1 }
 0x1f3   : > { %706 = vmatprep.subr.msk.mxu1 %vm379_vm3, %v361_v29 }
 0x1f4   : > { %707 = vmatpush3.msk.msra.mxu1 %vm379_vm3, %v361_v29 }
 0x1f5   : > { %709 = vmatmul.mubr.msk.f32.vlgmr.msra.gmra.mxu1 %vm366_vm2, %v363_v31 }
 0x1f6   : > { %711 = vmatprep.mubr.msk.f32.mxu1 %vm366_vm2, %v364_v32 }
 0x1f9   : > { %712 = vmatmul.mubr.msk.f32.gmra.mxu1 %vm366_vm2, %v365_v33 }
 0x2b5   : > { %v710_v35 = vpop.f32.mrf.mxu1 }
 0x2b6   : > { %v631_v36 = vmul.f32 -1.442695, %v710_v35 }
 0x2b7   : > { %v449_v37 = vpop.f32.mrf.mxu1 }
 0x2b8   : > { %v630_v38 = vmul.f32 -1.442695, %v449_v37  ;;  %770 = vpow2.f32 %v631_v36 }
 0x2b9   : > { %v713_v39 = vpop.f32.mrf.mxu1 }
 0x2ba   : > { %772 = vpow2.f32 %v630_v38  ;;  %v633_v40 = vmul.f32 -1.442695, %v713_v39 }
 0x2bb   : > { %v459_v41 = vpop.f32.mrf.mxu1 }
 0x2bc   : > { %v632_v42 = vmul.f32 -1.442695, %v459_v41  ;;  %774 = vpow2.f32 %v633_v40 }
 0x2be   : > { %776 = vpow2.f32 %v632_v42 }
 0x2c5   : > { %v771_v43 = vpop.eup %770 }
 0x2c6   : > { %v481_v46 = vadd.f32 1.0, %v771_v43 }
 0x2c7   : > { %v773_v44 = vpop.eup %772 }
 0x2c8   : > { %v480_v45 = vadd.f32 1.0, %v773_v44 }
 0x2c9   : > { %v775_v47 = vpop.eup %774 }
 0x2ca   : > { %778 = vrcp.f32 %v480_v45  ;;  %v483_v50 = vadd.f32 1.0, %v775_v47 }
 0x2cb   : > { %v777_v48 = vpop.eup %776  ;;  %780 = vrcp.f32 %v481_v46 }
 0x2cc   : > { %v482_v49 = vadd.f32 1.0, %v777_v48 }
 0x2ce   : > { %782 = vrcp.f32 %v482_v49 }
 0x2cf   : > { %784 = vrcp.f32 %v483_v50 }
 0x2d7   : > { %v779_v51 = vpop.eup %778 }
 0x2d8   : > { %494 = vperm.xlu0 %768, %v779_v51   ;;  %v781_v52 = vpop.eup %780 }
 0x2db   : > { %v783_v53 = vpop.eup %782 }
 0x2dc   : > { %499 = vperm.xlu0 %768, %v781_v52   ;;  %504 = vperm.xlu1 %769, %v783_v53   ;;  %v785_v54 = vpop.eup %784 }
 0x2e0   : > { %509 = vperm.xlu1 %769, %v785_v54  }
 0x353   : > { %v495_v55 = vpop.permute.xlu0 %494 }
 0x354   : > { %v512_v56 = vmul.f32 %v495_v55, %v1024_v2  ;;  %v513_v57 = vmul.f32 %v495_v55, %v1020_v1 }
 0x356   : > { %520 = vst [vmem:[%s188_s27] sm:$0xff] %v512_v56  ;;  %521 = vst [vmem:[%s188_s27 + $0x8] sm:$0xff] %v513_v57 }
 0x357   : > { %v500_v58 = vpop.permute.xlu0 %499  ;;  %v505_v59 = vpop.permute.xlu1 %504 }
 0x358   : > { %v514_v60 = vmul.f32 %v500_v58, %v1032_v4  ;;  %v515_v61 = vmul.f32 %v500_v58, %v1027_v3  ;;  %v516_v62 = vmul.f32 %v505_v59, %v1040_v6  ;;  %v517_v63 = vmul.f32 %v505_v59, %v1035_v5 }
 0x35a   : > { %522 = vst [vmem:[%s188_s27 + $0x10] sm:$0xff] %v514_v60  ;;  %523 = vst [vmem:[%s188_s27 + $0x18] sm:$0xff] %v515_v61 }
 0x35b   : > { %524 = vst [vmem:[%s188_s27 + $0x20] sm:$0xff] %v516_v62  ;;  %525 = vst [vmem:[%s188_s27 + $0x28] sm:$0xff] %v517_v63  ;;  %v510_v0 = vpop.permute.xlu1 %509 }
 0x35c   : > { %v518_v1 = vmul.f32 %v510_v0, %v1048_v8  ;;  %v519_v2 = vmul.f32 %v510_v0, %v1043_v7 }
 0x35e   : > { %526 = vst [vmem:[%s188_s27 + $0x30] sm:$0xff] %v518_v1  ;;  %527 = vst [vmem:[%s188_s27 + $0x38] sm:$0xff] %v519_v2 }
 0x35f   : > { %827 = shalt.err (!%p824_p10)
}
 0x360   : > { %s828_s7 = scalar_lea.hbm %s1080_s10, 1024  ;;  %s832_s19 = scalar_lea.hbm %s1128_s3, 2048 }
 0x361   : > { %p829_p0 = scmp.ne.s32.totalorder %s1080_s10, %s828_s7  ;;  %p833_p1 = scmp.lt.s32.totalorder %s1080_s10, %s1128_s3 }
 0x362   : > { %p834_p3 = scmp.lt.s32.totalorder %s832_s19, %s828_s7 }
 0x363   : > { %p830_p2 = pnand %p829_p0, %p1137_p12 }
 0x364   : > { %p835_p6 = por %p834_p3, %p833_p1 }
 0x365   : > { %p831_p9 = pneg %p830_p2 }
 0x367   : > { %p836_p11 = pnand %p835_p6, %p831_p9 }
 0x369   : > { %839 = shalt.err (!%p836_p11)
}
 0x36a   : > { %s888_s26 = smov 256   ;;  %s889_s27 = smov 16  }
 0x36b   : > { %716 = dma.vmem_to_hbm [thread:$0]  (%p1137_p12), %s1075_s28, 1024, %s1080_s10, %s529_s16, %s888_s26, %s888_s26, %s889_s27  }
 0x36c PF: > { %s557_s29 = sand.u32 1, %s866_s12   ;;  %p1138_p13 = scmp.ne.s32.totalorder %s1134_s25, 0 }
 0x36d   : > { %p1139_p4 = scmp.ge.s32.totalorder %s878_s15, 2  ;;  %s558_s30 = scalar_lea.sflag [#allocation4], %s557_s29 }
 0x36f   : > { %p723_p5 = pnand %p1139_p4, %p1138_p13 }
 0x371   : > { %p724_p7 = pneg %p723_p5 }
 0x373   : > { %861 = dma.done.wait (%p724_p7), %s558_s30, 1024  }
 0x374   : > { %863 = vsyncadd (%p724_p7), %s558_s30, 4294966272  ;;  %p16_p8 = scmp.ge.s32.totalorder %s935_s18, 4   ;;  %s1140_s12 = smov %s870_s13 }
 0x375   : > { %s1141_s13 = smov %s874_s14  ;;  %s1142_s14 = smov %s947_s21 }
 0x376   : > { %s1143_s15 = smov %s935_s18  ;;  %18 = sbr.rel (!%p16_p8) target bundleno = 5 (0x5), region = 77 }
 0x37b   :  { %563 = vsyncpa [#allocation3], 1 }
 0x37c   :  { %565 = vsyncpa [#allocation3 + $0x1], 1 }
 0x37d   :  { %566 = vsyncpa [#allocation4], 1 }
 0x37e   :  { %568 = vsyncpa [#allocation4 + $0x1], 1 }

</bundles_post_ra>
